<compile_context>
chip_gen: v7x
topology: tpu7x:2x2x1
jax: 0.10.0
libtpu: 0.0.40
codegen_flags: <defaults>
</compile_context>

<pallas_src>
import jax
import jax.numpy as jnp
import numpy as np
from jax.experimental import pallas as pl
from jax.experimental.pallas import tpu as pltpu

_MIB = 1024 * 1024


def _round_up(x, m):
    return ((x + m - 1) // m) * m


# ---------------------------------------------------------------------------
# Kernels
# ---------------------------------------------------------------------------
def _inet_kernel_resident(x_ref, w1_ref, b1_ref, w2_ref, o_ref):
    """Whole weight set resident in VMEM; 1-D grid over batch tiles."""
    xb = x_ref[...].astype(jnp.bfloat16)
    # [tb, n_in_p] @ [n_in_p, n_hid_p] on the MXU, f32 accumulation.
    h = jnp.dot(xb, w1_ref[...], preferred_element_type=jnp.float32)
    h = jnp.tanh(h + b1_ref[...])  # bias add + tanh in f32 (VPU / EUP)
    o_ref[...] = jnp.dot(h.astype(jnp.bfloat16), w2_ref[...],
                         preferred_element_type=jnp.float32).astype(o_ref.dtype)


def _inet_kernel_ktiled(x_ref, w1_ref, b1_ref, w2_ref, o_ref, acc_ref):
    """Hidden axis tiled onto grid axis 1 ('arbitrary'); f32 accumulator scratch."""
    k = pl.program_id(1)

    @pl.when(k == 0)
    def _():
        acc_ref[...] = jnp.zeros_like(acc_ref)

    xb = x_ref[...].astype(jnp.bfloat16)
    h = jnp.dot(xb, w1_ref[...], preferred_element_type=jnp.float32)
    h = jnp.tanh(h + b1_ref[...])
    acc_ref[...] += jnp.dot(h.astype(jnp.bfloat16), w2_ref[...],
                            preferred_element_type=jnp.float32)

    @pl.when(k == pl.num_programs(1) - 1)
    def _():
        o_ref[...] = acc_ref[...].astype(o_ref.dtype)


# ---------------------------------------------------------------------------
# Wrapper
# ---------------------------------------------------------------------------
def inet_forward(x, w1, b1, w2, *, out_dtype=jnp.float32,
                 weight_vmem_budget_bytes=20 * _MIB,
                 vmem_budget_bytes=44 * _MIB):
    """Computes tanh(x @ w1 + b1) @ w2.

    x: [B, n_in]; w1: [n_in, n_hidden]; b1: [1, n_hidden]; w2: [n_hidden, n_out].
    Weights are stored pre-transposed relative to PyTorch nn.Linear.
    """
    B, n_in = x.shape
    n_hidden = w1.shape[1]
    n_out = w2.shape[1]
    out_bytes = np.dtype(out_dtype).itemsize

    # Lane / MXU friendly padding on feature axes (multiples of 128); zero pad is exact.
    n_in_p = _round_up(n_in, 128)
    n_out_p = _round_up(n_out, 128)
    n_hid_128 = _round_up(n_hidden, 128)

    # --- hidden-axis tiling decision (guard for v7x's 64 MiB physical VMEM) --------
    resident_w_bytes = (n_in_p + n_out_p) * n_hid_128 * 2 + n_hid_128 * 4
    if resident_w_bytes <= weight_vmem_budget_bytes:
        thk = n_hid_128                       # all weights resident, single K step
    else:
        # double-buffered bytes per hidden column (w1 col + w2 row + b1 element)
        per_col = 2 * ((n_in_p + n_out_p) * 2 + 4)
        thk = max(128, (weight_vmem_budget_bytes // per_col) // 128 * 128)
        thk = min(thk, n_hid_128)
    n_hid_p = _round_up(n_hidden, thk)        # K blocks must be fully in-bounds (zero pad)
    grid_k = n_hid_p // thk
    wbuf = 1 if grid_k == 1 else 2            # grid-invariant weights -> single buffer
    wblock_bytes = wbuf * ((n_in_p + n_out_p) * thk * 2 + thk * 4)

    # --- x: pad the feature axis only when required --------------------------------
    if n_in_p != n_in:
        x_in = jnp.pad(x, ((0, 0), (0, n_in_p - n_in))).astype(jnp.bfloat16)
        x_bytes = 2
    else:
        x_in = x                              # stream as-is; cast to bf16 in-kernel
        x_bytes = x.dtype.itemsize

    # --- batch tile / grid ----------------------------------------------------------
    row_bytes = (n_in_p * x_bytes * 2         # double-buffered x tile
                 + n_out_p * out_bytes * 2    # double-buffered out tile
                 + n_out_p * 4                # f32 accumulator / result
                 + thk * (4 + 2))             # h in f32 + bf16 copy for 2nd matmul
    tb_cap = max(8, ((vmem_budget_bytes - wblock_bytes) // row_bytes) // 8 * 8)

    tb = _round_up(pl.cdiv(B, 8), 8)                       # aim for ~8 batch tiles
    tb = min(max(tb, 128), 2048)                           # big tiles amortize per-step cost
    tb = min(tb, max(_round_up(pl.cdiv(B, 2), 8), 8))      # but keep >=2 steps (v7x megacore)
    tb = max(min(tb, tb_cap), 8)
    grid_b = pl.cdiv(B, tb)                   # ragged last batch block handled by Pallas

    # --- padded / cast weights (bf16 on the MXU; zero padding is exact) -------------
    w1_p = jnp.pad(w1, ((0, n_in_p - n_in), (0, n_hid_p - n_hidden))).astype(jnp.bfloat16)
    b1_p = jnp.pad(b1, ((0, 0), (0, n_hid_p - n_hidden))).astype(jnp.float32)
    w2_p = jnp.pad(w2, ((0, n_hid_p - n_hidden), (0, n_out_p - n_out))).astype(jnp.bfloat16)

    vmem_needed = wblock_bytes + tb * row_bytes
    vmem_limit = int(min(max(2 * vmem_needed, 32 * _MIB), 56 * _MIB))

    cost = pl.CostEstimate(
        flops=2 * B * (n_in_p * n_hid_p + n_hid_p * n_out_p),
        transcendentals=B * n_hid_p,
        bytes_accessed=int(B * n_in_p * x_bytes
                           + (n_in_p + n_out_p) * n_hid_p * 2 + n_hid_p * 4
                           + B * n_out_p * out_bytes),
    )
    out_shape = jax.ShapeDtypeStruct((B, n_out_p), out_dtype)

    if grid_k == 1:
        def run(single_buffer_weights):
            wkw = ({"pipeline_mode": pl.Buffered(1)} if single_buffer_weights else {})
            return pl.pallas_call(
                _inet_kernel_resident,
                out_shape=out_shape,
                grid=(grid_b,),
                in_specs=[
                    # x streams tile-by-tile over the batch axis.
                    pl.BlockSpec((tb, n_in_p), lambda i: (i, 0)),
                    # Weights / bias: constant index_map -> VMEM-resident across steps.
                    pl.BlockSpec((n_in_p, n_hid_p), lambda i: (0, 0), **wkw),
                    pl.BlockSpec((1, n_hid_p), lambda i: (0, 0), **wkw),
                    pl.BlockSpec((n_hid_p, n_out_p), lambda i: (0, 0), **wkw),
                ],
                # Lane-dense (multiple-of-128) output slab -> unmasked vector stores.
                out_specs=pl.BlockSpec((tb, n_out_p), lambda i: (i, 0)),
                compiler_params=pltpu.CompilerParams(
                    dimension_semantics=("parallel",),
                    vmem_limit_bytes=vmem_limit),
                cost_estimate=cost,
            )(x_in, w1_p, b1_p, w2_p)

        try:
            out_p = run(True)     # single-buffered grid-invariant weights
        except Exception:
            out_p = run(False)    # fallback if pipeline_mode=Buffered(1) unsupported
    else:
        out_p = pl.pallas_call(
            _inet_kernel_ktiled,
            out_shape=out_shape,
            grid=(grid_b, grid_k),
            in_specs=[
                pl.BlockSpec((tb, n_in_p), lambda i, k: (i, 0)),   # resident across k
                pl.BlockSpec((n_in_p, thk), lambda i, k: (0, k)),
                pl.BlockSpec((1, thk), lambda i, k: (0, k)),
                pl.BlockSpec((thk, n_out_p), lambda i, k: (k, 0)),
            ],
            out_specs=pl.BlockSpec((tb, n_out_p), lambda i, k: (i, 0)),
            scratch_shapes=[pltpu.VMEM((tb, n_out_p), jnp.float32)],
            compiler_params=pltpu.CompilerParams(
                dimension_semantics=("parallel", "arbitrary"),
                vmem_limit_bytes=vmem_limit),
            cost_estimate=cost,
        )(x_in, w1_p, b1_p, w2_p)

    return out_p if n_out_p == n_out else out_p[:, :n_out]


# ---------------------------------------------------------------------------
# Params / reference
# ---------------------------------------------------------------------------
def init_params(key, n_in, n_hidden, n_out, dtype=jnp.float32):
    """PyTorch nn.Linear default init: U[-1/sqrt(fan_in), 1/sqrt(fan_in)]."""
    k1, k2, k3 = jax.random.split(key, 3)
    bound1 = 1.0 / jnp.sqrt(jnp.asarray(n_in, dtype))
    bound2 = 1.0 / jnp.sqrt(jnp.asarray(n_hidden, dtype))
    # Stored pre-transposed relative to PyTorch so the kernel does x @ W directly.
    w1 = jax.random.uniform(k1, (n_in, n_hidden), dtype, -bound1, bound1)
    b1 = jax.random.uniform(k2, (1, n_hidden), dtype, -bound1, bound1)
    w2 = jax.random.uniform(k3, (n_hidden, n_out), dtype, -bound2, bound2)
    return w1, b1, w2


def _reference(x, w1, b1, w2):
    # Pure-JAX reference replicating the kernel's bf16 operand quantization
    # (matmuls accumulate in f32; bias add and tanh in f32).
    xb = x.astype(jnp.bfloat16).astype(jnp.float32)
    w1b = w1.astype(jnp.bfloat16).astype(jnp.float32)
    w2b = w2.astype(jnp.bfloat16).astype(jnp.float32)
    h = jnp.tanh(xb @ w1b + b1)
    hb = h.astype(jnp.bfloat16).astype(jnp.float32)
    return hb @ w2b


if __name__ == "__main__":
    key = jax.random.PRNGKey(0)

    def check(B, n_in, n_hidden, n_out, **fwd_kwargs):
        kx, kp = jax.random.split(jax.random.fold_in(key, B * 1000 + n_hidden))
        x = jax.random.normal(kx, (B, n_in), jnp.float32)
        w1, b1, w2 = init_params(kp, n_in, n_hidden, n_out)
        out = inet_forward(x, w1, b1, w2, **fwd_kwargs)
        jax.block_until_ready(out)
        ref = _reference(x, w1, b1, w2)
        assert out.shape == (B, n_out), out.shape
        assert jnp.allclose(out, ref, atol=1e-2, rtol=1e-2), (
            f"max abs err {jnp.max(jnp.abs(out - ref))}")

    # Small shapes consistent with the module's forward (input is [batch, n_in]).
    check(8, 32, 64, 16)                        # resident-weight path, aligned batch
    check(20, 32, 64, 16)                       # ragged last batch tile (no batch padding)
    check(24, 32, 200, 48,                      # force the hidden-axis (K) tiled guard path
          weight_vmem_budget_bytes=1)

    print("KERNEL_OK")
</pallas_src>

<mosaic_0001>
module attributes {stable_mosaic.version = 11 : i64} {
  func.func @_inet_kernel_resident(%arg0: i32, %arg1: memref<8x128xbf16, #tpu.memory_space<vmem>>, %arg2: memref<128x128xbf16, #tpu.memory_space<vmem>>, %arg3: memref<1x128xf32, #tpu.memory_space<vmem>>, %arg4: memref<128x128xbf16, #tpu.memory_space<vmem>>, %arg5: memref<8x128xf32, #tpu.memory_space<vmem>>) attributes {dimension_semantics = [#tpu.dimension_semantics<parallel>], iteration_bounds = array<i64: 1>, scalar_prefetch = 0 : i64, scratch_operands = 0 : i64, tpu.core_type = #tpu.core_type<tc>, window_params = [{transform_indices = @transform_0, window_bounds = array<i64: 8, 128>}, {pipeline_mode = #tpu.pipeline_mode<synchronous>, transform_indices = @transform_1, window_bounds = array<i64: 128, 128>}, {pipeline_mode = #tpu.pipeline_mode<synchronous>, transform_indices = @transform_2, window_bounds = array<i64: 1, 128>}, {pipeline_mode = #tpu.pipeline_mode<synchronous>, transform_indices = @transform_3, window_bounds = array<i64: 128, 128>}, {transform_indices = @transform_4, window_bounds = array<i64: 8, 128>}]} {
    %c0 = arith.constant 0 : index
    %c0_0 = arith.constant 0 : index
    %0 = vector.load %arg1[%c0, %c0_0] : memref<8x128xbf16, #tpu.memory_space<vmem>>, vector<8x128xbf16>
    %c0_1 = arith.constant 0 : index
    %c0_2 = arith.constant 0 : index
    %1 = vector.load %arg2[%c0_1, %c0_2] : memref<128x128xbf16, #tpu.memory_space<vmem>>, vector<128x128xbf16>
    %cst = arith.constant dense<0.000000e+00> : vector<8x128xf32>
    %2 = tpu.matmul %0, %1, %cst {dimension_numbers = #tpu.dot_dimension_numbers<[1], [0], [0], [1], [0, 0, 1, 1], [], []>} : vector<8x128xbf16>, vector<128x128xbf16>, vector<8x128xf32> -> vector<8x128xf32>
    %c0_3 = arith.constant 0 : index
    %c0_4 = arith.constant 0 : index
    %3 = vector.load %arg3[%c0_3, %c0_4] : memref<1x128xf32, #tpu.memory_space<vmem>>, vector<1x128xf32>
    %4 = vector.broadcast %3 : vector<1x128xf32> to vector<8x128xf32>
    %5 = arith.addf %2, %4 : vector<8x128xf32>
    %6 = math.tanh %5 : vector<8x128xf32>
    %7 = arith.truncf %6 : vector<8x128xf32> to vector<8x128xbf16>
    %c0_5 = arith.constant 0 : index
    %c0_6 = arith.constant 0 : index
    %8 = vector.load %arg4[%c0_5, %c0_6] : memref<128x128xbf16, #tpu.memory_space<vmem>>, vector<128x128xbf16>
    %cst_7 = arith.constant dense<0.000000e+00> : vector<8x128xf32>
    %9 = tpu.matmul %7, %8, %cst_7 {dimension_numbers = #tpu.dot_dimension_numbers<[1], [0], [0], [1], [0, 0, 1, 1], [], []>} : vector<8x128xbf16>, vector<128x128xbf16>, vector<8x128xf32> -> vector<8x128xf32>
    %c0_8 = arith.constant 0 : index
    %c0_9 = arith.constant 0 : index
    %10 = vector.load %arg5[%c0_8, %c0_9] : memref<8x128xf32, #tpu.memory_space<vmem>>, vector<8x128xf32>
    tpu.vector_store %arg5[%c0_8, %c0_9], %9 {strides = array<i32>} : memref<8x128xf32, #tpu.memory_space<vmem>>, vector<8x128xf32>,
    return
  }
  func.func @transform_0(%arg0: i32) -> (i32, i32) {
    %c0_i32 = arith.constant 0 : i32
    %c0_i32_0 = arith.constant 0 : i32
    return %arg0, %c0_i32 : i32, i32
  }
  func.func @transform_1(%arg0: i32) -> (i32, i32) {
    %c0_i32 = arith.constant 0 : i32
    %c0_i32_0 = arith.constant 0 : i32
    %c0_i32_1 = arith.constant 0 : i32
    return %c0_i32, %c0_i32_0 : i32, i32
  }
  func.func @transform_2(%arg0: i32) -> (i32, i32) {
    %c0_i32 = arith.constant 0 : i32
    %c0_i32_0 = arith.constant 0 : i32
    %c0_i32_1 = arith.constant 0 : i32
    return %c0_i32, %c0_i32_0 : i32, i32
  }
  func.func @transform_3(%arg0: i32) -> (i32, i32) {
    %c0_i32 = arith.constant 0 : i32
    %c0_i32_0 = arith.constant 0 : i32
    %c0_i32_1 = arith.constant 0 : i32
    return %c0_i32, %c0_i32_0 : i32, i32
  }
  func.func @transform_4(%arg0: i32) -> (i32, i32) {
    %c0_i32 = arith.constant 0 : i32
    %c0_i32_0 = arith.constant 0 : i32
    return %arg0, %c0_i32 : i32, i32
  }
}

module attributes {stable_mosaic.version = 11 : i64} {
  func.func @_inet_kernel_resident(%arg0: i32, %arg1: memref<8x128xbf16, #tpu.memory_space<vmem>>, %arg2: memref<128x128xbf16, #tpu.memory_space<vmem>>, %arg3: memref<1x128xf32, #tpu.memory_space<vmem>>, %arg4: memref<128x128xbf16, #tpu.memory_space<vmem>>, %arg5: memref<8x128xf32, #tpu.memory_space<vmem>>) attributes {dimension_semantics = [#tpu.dimension_semantics<parallel>], iteration_bounds = array<i64: 1>, scalar_prefetch = 0 : i64, scratch_operands = 0 : i64, tpu.core_type = #tpu.core_type<tc>, window_params = [{transform_indices = @transform_0, window_bounds = array<i64: 8, 128>}, {pipeline_mode = #tpu.pipeline_mode<synchronous>, transform_indices = @transform_1, window_bounds = array<i64: 128, 128>}, {pipeline_mode = #tpu.pipeline_mode<synchronous>, transform_indices = @transform_2, window_bounds = array<i64: 1, 128>}, {pipeline_mode = #tpu.pipeline_mode<synchronous>, transform_indices = @transform_3, window_bounds = array<i64: 128, 128>}, {transform_indices = @transform_4, window_bounds = array<i64: 8, 128>}]} {
    %c0 = arith.constant 0 : index
    %c0_0 = arith.constant 0 : index
    %0 = vector.load %arg1[%c0, %c0_0] : memref<8x128xbf16, #tpu.memory_space<vmem>>, vector<8x128xbf16>
    %c0_1 = arith.constant 0 : index
    %c0_2 = arith.constant 0 : index
    %1 = vector.load %arg2[%c0_1, %c0_2] : memref<128x128xbf16, #tpu.memory_space<vmem>>, vector<128x128xbf16>
    %cst = arith.constant dense<0.000000e+00> : vector<8x128xf32>
    %2 = tpu.matmul %0, %1, %cst {dimension_numbers = #tpu.dot_dimension_numbers<[1], [0], [0], [1], [0, 0, 1, 1], [], []>} : vector<8x128xbf16>, vector<128x128xbf16>, vector<8x128xf32> -> vector<8x128xf32>
    %c0_3 = arith.constant 0 : index
    %c0_4 = arith.constant 0 : index
    %3 = vector.load %arg3[%c0_3, %c0_4] : memref<1x128xf32, #tpu.memory_space<vmem>>, vector<1x128xf32>
    %4 = vector.broadcast %3 : vector<1x128xf32> to vector<8x128xf32>
    %5 = arith.addf %2, %4 : vector<8x128xf32>
    %6 = math.tanh %5 : vector<8x128xf32>
    %7 = arith.truncf %6 : vector<8x128xf32> to vector<8x128xbf16>
    %c0_5 = arith.constant 0 : index
    %c0_6 = arith.constant 0 : index
    %8 = vector.load %arg4[%c0_5, %c0_6] : memref<128x128xbf16, #tpu.memory_space<vmem>>, vector<128x128xbf16>
    %cst_7 = arith.constant dense<0.000000e+00> : vector<8x128xf32>
    %9 = tpu.matmul %7, %8, %cst_7 {dimension_numbers = #tpu.dot_dimension_numbers<[1], [0], [0], [1], [0, 0, 1, 1], [], []>} : vector<8x128xbf16>, vector<128x128xbf16>, vector<8x128xf32> -> vector<8x128xf32>
    %c0_8 = arith.constant 0 : index
    %c0_9 = arith.constant 0 : index
    %10 = vector.load %arg5[%c0_8, %c0_9] : memref<8x128xf32, #tpu.memory_space<vmem>>, vector<8x128xf32>
    tpu.vector_store %arg5[%c0_8, %c0_9], %9 {strides = array<i32>} : memref<8x128xf32, #tpu.memory_space<vmem>>, vector<8x128xf32>,
    return
  }
  func.func @transform_0(%arg0: i32) -> (i32, i32) {
    %c0_i32 = arith.constant 0 : i32
    %c0_i32_0 = arith.constant 0 : i32
    return %arg0, %c0_i32 : i32, i32
  }
  func.func @transform_1(%arg0: i32) -> (i32, i32) {
    %c0_i32 = arith.constant 0 : i32
    %c0_i32_0 = arith.constant 0 : i32
    %c0_i32_1 = arith.constant 0 : i32
    return %c0_i32, %c0_i32_0 : i32, i32
  }
  func.func @transform_2(%arg0: i32) -> (i32, i32) {
    %c0_i32 = arith.constant 0 : i32
    %c0_i32_0 = arith.constant 0 : i32
    %c0_i32_1 = arith.constant 0 : i32
    return %c0_i32, %c0_i32_0 : i32, i32
  }
  func.func @transform_3(%arg0: i32) -> (i32, i32) {
    %c0_i32 = arith.constant 0 : i32
    %c0_i32_0 = arith.constant 0 : i32
    %c0_i32_1 = arith.constant 0 : i32
    return %c0_i32, %c0_i32_0 : i32, i32
  }
  func.func @transform_4(%arg0: i32) -> (i32, i32) {
    %c0_i32 = arith.constant 0 : i32
    %c0_i32_0 = arith.constant 0 : i32
    return %arg0, %c0_i32 : i32, i32
  }
}

</mosaic_0001>

<bundles_post_ra>
// kernel: tpu_custom_call.1
= control target key start
LH: loop header
LB: loop body
LE: loop exit
PB: predicated region body
PF: predicated region fallthrough
CT: control target
= control target key end

     0   :  { %9 = vsyncpa [#allocation3], 0  ;;  %s578_s0 = inlined_call_operand.hbm [shape: bf16[8,128], index: 0, kind: input, shape index: {}]   ;;  %s579_s1 = inlined_call_operand.hbm [shape: bf16[128,128], index: 1, kind: input, shape index: {}]   ;;  %s580_s2 = inlined_call_operand.vmem [shape: f32[1,128], index: 2, kind: input, shape index: {}]   ;;  %s581_s3 = inlined_call_operand.hbm [shape: bf16[128,128], index: 3, kind: input, shape index: {}]   ;;  %s582_s4 = inlined_call_operand.hbm [shape: f32[8,128], index: 4, kind: output, shape index: {}]  }
   0x1   :  { %10 = vsyncpa [#allocation6], 0 }
   0x2   :  { %11 = vsyncpa [#allocation4], 0  ;;  %s488_s15 = smov [#allocation5]   ;;  %s394_s19 = scalar_lea.hbm %s579_s1, 1024 }
   0x3   :  { %s27_s16 = sshll.u32 %s488_s15, 4  ;;  %p395_p0 = scmp.ne.s32.totalorder %s579_s1, %s394_s19  ;;  %s28_s16 = int_to_ptr.vmem [resolvable:$true] %s27_s16 }
   0x4   :  { %p398_p1 = scmp.lt.u32.totalorder %s394_s19, %s579_s1 }
   0x6   :  { %p400_p2 = pnand %p398_p1, %p395_p0 }
   0x8   :  { %403 = shalt.err (!%p400_p2)
}
   0x9   :  { %s404_s24 = scalar_lea.vmem %s28_s16, 1024  ;;  %p409_p4 = scmp.lt.s32.totalorder %s28_s16, %s28_s16 }
   0xa   :  { %p405_p3 = scmp.ne.s32.totalorder %s28_s16, %s404_s24  ;;  %p410_p5 = scmp.lt.s32.totalorder %s404_s24, %s404_s24 }
   0xc   :  { %p411_p6 = por %p410_p5, %p409_p4 }
   0xe   :  { %p412_p7 = pnand %p411_p6, %p405_p3 }
  0x10   :  { %415 = shalt.err (!%p412_p7)
}
  0x11   :  { %s489_s25 = smov 64   ;;  %s490_s26 = smov 4  }
  0x12   :  { %33 = dma.hbm_to_vmem [thread:$0]  %s579_s1, 1024, %s28_s16, [#allocation6], %s489_s25, %s489_s25, %s490_s26  }
  0x13   :  { %s491_s29 = smov [#allocation2]   ;;  %s492_s5 = smov [#allocation7]  }
  0x14   :  { %s18_s30 = sshll.u32 %s491_s29, 4  ;;  %s41_s6 = sshll.u32 %s492_s5, 4  ;;  %s19_s30 = int_to_ptr.vmem [resolvable:$true] %s18_s30  ;;  %s42_s6 = int_to_ptr.vmem [resolvable:$true] %s41_s6 }
  0x15   :  { %s416_s9 = scalar_lea.hbm %s578_s0, 64 }
  0x16   :  { %p417_p8 = scmp.ne.s32.totalorder %s578_s0, %s416_s9  ;;  %p420_p9 = scmp.lt.u32.totalorder %s416_s9, %s578_s0 }
  0x18   :  { %p422_p10 = pnand %p420_p9, %p417_p8 }
  0x1a   :  { %425 = shalt.err (!%p422_p10)
}
  0x1b   :  { %s426_s1 = scalar_lea.vmem %s19_s30, 64  ;;  %p431_p12 = scmp.lt.s32.totalorder %s19_s30, %s19_s30 }
  0x1c   :  { %p427_p11 = scmp.ne.s32.totalorder %s19_s30, %s426_s1  ;;  %p432_p13 = scmp.lt.s32.totalorder %s426_s1, %s426_s1 }
  0x1e   :  { %p433_p0 = por %p432_p13, %p431_p12 }
  0x20   :  { %p434_p1 = pnand %p433_p0, %p427_p11 }
  0x22   :  { %437 = shalt.err (!%p434_p1)
}
  0x23   :  { %21 = dma.hbm_to_vmem [thread:$0]  %s578_s0, 64, %s19_s30, [#allocation3]  }
  0x24   :  { %s438_s18 = scalar_lea.hbm %s581_s3, 1024 }
  0x25   :  { %p439_p2 = scmp.ne.s32.totalorder %s581_s3, %s438_s18  ;;  %p442_p3 = scmp.lt.u32.totalorder %s438_s18, %s581_s3 }
  0x27   :  { %p444_p4 = pnand %p442_p3, %p439_p2 }
  0x29   :  { %447 = shalt.err (!%p444_p4)
}
  0x2a   :  { %s448_s23 = scalar_lea.vmem %s42_s6, 1024  ;;  %p453_p6 = scmp.lt.s32.totalorder %s42_s6, %s42_s6 }
  0x2b   :  { %p449_p5 = scmp.ne.s32.totalorder %s42_s6, %s448_s23  ;;  %p454_p7 = scmp.lt.s32.totalorder %s448_s23, %s448_s23 }
  0x2d   :  { %p455_p8 = por %p454_p7, %p453_p6 }
  0x2f   :  { %p456_p9 = pnand %p455_p8, %p449_p5 }
  0x31   :  { %459 = shalt.err (!%p456_p9)
}
  0x32   :  { %47 = dma.hbm_to_vmem [thread:$0]  %s581_s3, 1024, %s42_s6, [#allocation6], %s489_s25, %s489_s25, %s490_s26  }
  0x33   :  { %482 = dma.done.wait [#allocation3], 64  }
  0x34   :  { %483 = vsyncadd [#allocation3], 4294967232 }
  0x35   :  { %484 = dma.done.wait [#allocation6], 2048  }
  0x36   :  { %485 = vsyncadd [#allocation6], 4294965248  ;;  %v493_v0 = vmov 0.0   ;;  %vm494_vm0 = vmmov 0   ;;  %v376_v1 = vld [vmem:[#allocation5] sm:$0xff]   ;;  %v377_v2 = vld [vmem:[#allocation5 + $0x8] sm:$0xff]  }
  0x37   :  { %328 = vmatprep.subr.bf16.mxu0 %v493_v0  ;;  %344 = vmatprep.mubr.msk.bf16.mxu0 %vm494_vm0, %v493_v0  ;;  %v378_v3 = vld [vmem:[#allocation5 + $0x10] sm:$0xff]   ;;  %v384_v4 = vld [vmem:[#allocation7] sm:$0xff]   ;;  %v379_v5 = vld [vmem:[#allocation5 + $0x18] sm:$0xff]   ;;  %s495_s26 = smov [#allocation8]  }
  0x38   :  { %348 = vmatprep.subr.bf16.mxu1 %v493_v0  ;;  %364 = vmatprep.mubr.msk.bf16.mxu1 %vm494_vm0, %v493_v0  ;;  %v385_v6 = vld [vmem:[#allocation7 + $0x8] sm:$0xff]   ;;  %v380_v7 = vld [vmem:[#allocation5 + $0x20] sm:$0xff]   ;;  %v386_v8 = vld [vmem:[#allocation7 + $0x10] sm:$0xff]   ;;  %s283_s27 = sshll.u32 %s495_s26, 4  ;;  %s284_s27 = int_to_ptr.vmem [resolvable:$true] %s283_s27 }
  0x39   :  { %329 = vmatpush3.bf16.msra.mxu0 %v376_v1  ;;  %349 = vmatpush3.bf16.msra.mxu1 %v384_v4  ;;  %v381_v9 = vld [vmem:[#allocation5 + $0x28] sm:$0xff]   ;;  %v387_v10 = vld [vmem:[#allocation7 + $0x18] sm:$0xff]   ;;  %v382_v11 = vld [vmem:[#allocation5 + $0x30] sm:$0xff]   ;;  %s460_s28 = scalar_lea.vmem %s284_s27, 128  ;;  %p465_p11 = scmp.lt.s32.totalorder %s284_s27, %s284_s27 }
  0x3a   :  { %330 = vmatprep.subr.bf16.mxu0 %v493_v0  ;;  %350 = vmatprep.subr.bf16.mxu1 %v493_v0  ;;  %v383_v12 = vld [vmem:[#allocation5 + $0x38] sm:$0xff]   ;;  %v388_v14 = vld [vmem:[#allocation7 + $0x20] sm:$0xff]   ;;  %v389_v15 = vld [vmem:[#allocation7 + $0x28] sm:$0xff]   ;;  %p461_p10 = scmp.ne.s32.totalorder %s284_s27, %s460_s28  ;;  %p466_p12 = scmp.lt.s32.totalorder %s460_s28, %s460_s28 }
  0x3b   :  { %v58_v13 = vld [vmem:[#allocation2] sm:$0xf]  ;;  %v390_v16 = vld [vmem:[#allocation7 + $0x30] sm:$0xff]  }
  0x3c   :  { %v391_v17 = vld [vmem:[#allocation7 + $0x38] sm:$0xff]   ;;  %p467_p13 = por %p466_p12, %p465_p11 }
  0x3d   :  { %331 = vmatpush3.bf16.msra.mxu0 %v377_v2  ;;  %351 = vmatpush3.bf16.msra.mxu1 %v385_v6  ;;  %v293_v18 = vld [vmem:[%s580_s2] ss:$0 sm:$0xff] }
  0x3e   :  { %332 = vmatprep.subr.bf16.mxu0 %v493_v0  ;;  %352 = vmatprep.subr.bf16.mxu1 %v493_v0  ;;  %p468_p0 = pnand %p467_p13, %p461_p10 }
  0x41   :  { %333 = vmatpush3.bf16.msra.mxu0 %v378_v3  ;;  %353 = vmatpush3.bf16.msra.mxu1 %v386_v8 }
  0x42   :  { %334 = vmatprep.subr.bf16.mxu0 %v493_v0  ;;  %354 = vmatprep.subr.bf16.mxu1 %v493_v0 }
  0x45   :  { %335 = vmatpush3.bf16.msra.mxu0 %v379_v5  ;;  %355 = vmatpush3.bf16.msra.mxu1 %v387_v10 }
  0x46   :  { %336 = vmatprep.subr.bf16.mxu0 %v493_v0  ;;  %356 = vmatprep.subr.bf16.mxu1 %v493_v0 }
  0x49   :  { %337 = vmatpush3.bf16.msra.mxu0 %v380_v7  ;;  %357 = vmatpush3.bf16.msra.mxu1 %v388_v14 }
  0x4a   :  { %338 = vmatprep.subr.bf16.mxu0 %v493_v0  ;;  %358 = vmatprep.subr.bf16.mxu1 %v493_v0 }
  0x4d   :  { %339 = vmatpush3.bf16.msra.mxu0 %v381_v9  ;;  %359 = vmatpush3.bf16.msra.mxu1 %v389_v15 }
  0x4e   :  { %340 = vmatprep.subr.bf16.mxu0 %v493_v0  ;;  %360 = vmatprep.subr.bf16.mxu1 %v493_v0 }
  0x51   :  { %341 = vmatpush3.bf16.msra.mxu0 %v382_v11  ;;  %361 = vmatpush3.bf16.msra.mxu1 %v390_v16 }
  0x52   :  { %342 = vmatprep.subr.bf16.mxu0 %v493_v0  ;;  %362 = vmatprep.subr.bf16.mxu1 %v493_v0 }
  0x55   :  { %343 = vmatpush3.bf16.msra.mxu0 %v383_v12  ;;  %363 = vmatpush3.bf16.msra.mxu1 %v391_v17 }
  0x58   :  { %345 = vmatmul.mubr.bf16.vlgmr.msra.gmra.mrb[0].mxu0 %v58_v13 }
 0x12b   :  { %v164_v19 = vpop.f32.mrb[0].mxu0 }
 0x12c   :  { %v165_v20 = vadd.f32 %v293_v18, %v164_v19  ;;  %v346_v21 = vpop.f32.mrb[1].mxu0 }
 0x12d   :  { %v167_v22 = vpop.f32.mrb[2].mxu0 }
 0x12e   :  { %392 = vtanh.f32 %v165_v20  ;;  %v347_v23 = vpop.f32.mrb[3].mxu0 }
 0x138   :  { %v393_v24 = vpop.eup %392 }
 0x139   :  { %v171_v25 = vpack.c.bf16 %v393_v24, %v393_v24 }
 0x13b   :  { %365 = vmatmul.mubr.bf16.vlgmr.msra.gmra.mrb[0].mxu1 %v171_v25 }
 0x20e   :  { %v270_v26 = vpop.f32.mrb[0].mxu1 }
 0x20f   :  { %276 = vst [vmem:[#allocation8] sm:$0xff] %v270_v26  ;;  %v366_v27 = vpop.f32.mrb[1].mxu1 }
 0x210   :  { %v273_v28 = vpop.f32.mrb[2].mxu1 }
 0x211   :  { %471 = shalt.err (!%p468_p0)
}
 0x212   :  { %s472_s30 = scalar_lea.hbm %s582_s4, 128 }
 0x213   :  { %p473_p1 = scmp.ne.s32.totalorder %s582_s4, %s472_s30  ;;  %p476_p2 = scmp.lt.u32.totalorder %s472_s30, %s582_s4 }
 0x215   :  { %p478_p3 = pnand %p476_p2, %p473_p1 }
 0x217   :  { %481 = shalt.err (!%p478_p3)
}
 0x218   :  { %286 = dma.vmem_to_hbm [thread:$0]  %s284_s27, 128, %s582_s4, [#allocation4]   ;;  %v367_v29 = vpop.f32.mrb[3].mxu1 }
 0x219   :  { %486 = dma.done.wait [#allocation4], 128  }
 0x21a   :  { %487 = vsyncadd [#allocation4], 4294967168 }
 0x21b   :  { %290 = vsyncpa [#allocation3], 1 }
 0x21c   :  { %291 = vsyncpa [#allocation6], 1 }
 0x21d   :  { %292 = vsyncpa [#allocation4], 1 }

// kernel: tpu_custom_call.1
= control target key start
LH: loop header
LB: loop body
LE: loop exit
PB: predicated region body
PF: predicated region fallthrough
CT: control target
= control target key end

     0   :  { %9 = vsyncpa [#allocation3], 0  ;;  %s578_s0 = inlined_call_operand.hbm [shape: bf16[8,128], index: 0, kind: input, shape index: {}]   ;;  %s579_s1 = inlined_call_operand.hbm [shape: bf16[128,128], index: 1, kind: input, shape index: {}]   ;;  %s580_s2 = inlined_call_operand.vmem [shape: f32[1,128], index: 2, kind: input, shape index: {}]   ;;  %s581_s3 = inlined_call_operand.hbm [shape: bf16[128,128], index: 3, kind: input, shape index: {}]   ;;  %s582_s4 = inlined_call_operand.hbm [shape: f32[8,128], index: 4, kind: output, shape index: {}]  }
   0x1   :  { %10 = vsyncpa [#allocation6], 0 }
   0x2   :  { %11 = vsyncpa [#allocation4], 0  ;;  %s488_s15 = smov [#allocation5]   ;;  %s394_s19 = scalar_lea.hbm %s579_s1, 1024 }
   0x3   :  { %s27_s16 = sshll.u32 %s488_s15, 4  ;;  %p395_p0 = scmp.ne.s32.totalorder %s579_s1, %s394_s19  ;;  %s28_s16 = int_to_ptr.vmem [resolvable:$true] %s27_s16 }
   0x4   :  { %p398_p1 = scmp.lt.u32.totalorder %s394_s19, %s579_s1 }
   0x6   :  { %p400_p2 = pnand %p398_p1, %p395_p0 }
   0x8   :  { %403 = shalt.err (!%p400_p2)
}
   0x9   :  { %s404_s24 = scalar_lea.vmem %s28_s16, 1024  ;;  %p409_p4 = scmp.lt.s32.totalorder %s28_s16, %s28_s16 }
   0xa   :  { %p405_p3 = scmp.ne.s32.totalorder %s28_s16, %s404_s24  ;;  %p410_p5 = scmp.lt.s32.totalorder %s404_s24, %s404_s24 }
   0xc   :  { %p411_p6 = por %p410_p5, %p409_p4 }
   0xe   :  { %p412_p7 = pnand %p411_p6, %p405_p3 }
  0x10   :  { %415 = shalt.err (!%p412_p7)
}
  0x11   :  { %s489_s25 = smov 64   ;;  %s490_s26 = smov 4  }
  0x12   :  { %33 = dma.hbm_to_vmem [thread:$0]  %s579_s1, 1024, %s28_s16, [#allocation6], %s489_s25, %s489_s25, %s490_s26  }
  0x13   :  { %s491_s29 = smov [#allocation2]   ;;  %s492_s5 = smov [#allocation7]  }
  0x14   :  { %s18_s30 = sshll.u32 %s491_s29, 4  ;;  %s41_s6 = sshll.u32 %s492_s5, 4  ;;  %s19_s30 = int_to_ptr.vmem [resolvable:$true] %s18_s30  ;;  %s42_s6 = int_to_ptr.vmem [resolvable:$true] %s41_s6 }
  0x15   :  { %s416_s9 = scalar_lea.hbm %s578_s0, 64 }
  0x16   :  { %p417_p8 = scmp.ne.s32.totalorder %s578_s0, %s416_s9  ;;  %p420_p9 = scmp.lt.u32.totalorder %s416_s9, %s578_s0 }
  0x18   :  { %p422_p10 = pnand %p420_p9, %p417_p8 }
  0x1a   :  { %425 = shalt.err (!%p422_p10)
}
  0x1b   :  { %s426_s1 = scalar_lea.vmem %s19_s30, 64  ;;  %p431_p12 = scmp.lt.s32.totalorder %s19_s30, %s19_s30 }
  0x1c   :  { %p427_p11 = scmp.ne.s32.totalorder %s19_s30, %s426_s1  ;;  %p432_p13 = scmp.lt.s32.totalorder %s426_s1, %s426_s1 }
  0x1e   :  { %p433_p0 = por %p432_p13, %p431_p12 }
  0x20   :  { %p434_p1 = pnand %p433_p0, %p427_p11 }
  0x22   :  { %437 = shalt.err (!%p434_p1)
}
  0x23   :  { %21 = dma.hbm_to_vmem [thread:$0]  %s578_s0, 64, %s19_s30, [#allocation3]  }
  0x24   :  { %s438_s18 = scalar_lea.hbm %s581_s3, 1024 }
  0x25   :  { %p439_p2 = scmp.ne.s32.totalorder %s581_s3, %s438_s18  ;;  %p442_p3 = scmp.lt.u32.totalorder %s438_s18, %s581_s3 }
  0x27   :  { %p444_p4 = pnand %p442_p3, %p439_p2 }
  0x29   :  { %447 = shalt.err (!%p444_p4)
}
  0x2a   :  { %s448_s23 = scalar_lea.vmem %s42_s6, 1024  ;;  %p453_p6 = scmp.lt.s32.totalorder %s42_s6, %s42_s6 }
  0x2b   :  { %p449_p5 = scmp.ne.s32.totalorder %s42_s6, %s448_s23  ;;  %p454_p7 = scmp.lt.s32.totalorder %s448_s23, %s448_s23 }
  0x2d   :  { %p455_p8 = por %p454_p7, %p453_p6 }
  0x2f   :  { %p456_p9 = pnand %p455_p8, %p449_p5 }
  0x31   :  { %459 = shalt.err (!%p456_p9)
}
  0x32   :  { %47 = dma.hbm_to_vmem [thread:$0]  %s581_s3, 1024, %s42_s6, [#allocation6], %s489_s25, %s489_s25, %s490_s26  }
  0x33   :  { %482 = dma.done.wait [#allocation3], 64  }
  0x34   :  { %483 = vsyncadd [#allocation3], 4294967232 }
  0x35   :  { %484 = dma.done.wait [#allocation6], 2048  }
  0x36   :  { %485 = vsyncadd [#allocation6], 4294965248  ;;  %v493_v0 = vmov 0.0   ;;  %vm494_vm0 = vmmov 0   ;;  %v376_v1 = vld [vmem:[#allocation5] sm:$0xff]   ;;  %v377_v2 = vld [vmem:[#allocation5 + $0x8] sm:$0xff]  }
  0x37   :  { %328 = vmatprep.subr.bf16.mxu0 %v493_v0  ;;  %344 = vmatprep.mubr.msk.bf16.mxu0 %vm494_vm0, %v493_v0  ;;  %v378_v3 = vld [vmem:[#allocation5 + $0x10] sm:$0xff]   ;;  %v384_v4 = vld [vmem:[#allocation7] sm:$0xff]   ;;  %v379_v5 = vld [vmem:[#allocation5 + $0x18] sm:$0xff]   ;;  %s495_s26 = smov [#allocation8]  }
  0x38   :  { %348 = vmatprep.subr.bf16.mxu1 %v493_v0  ;;  %364 = vmatprep.mubr.msk.bf16.mxu1 %vm494_vm0, %v493_v0  ;;  %v385_v6 = vld [vmem:[#allocation7 + $0x8] sm:$0xff]   ;;  %v380_v7 = vld [vmem:[#allocation5 + $0x20] sm:$0xff]   ;;  %v386_v8 = vld [vmem:[#allocation7 + $0x10] sm:$0xff]   ;;  %s283_s27 = sshll.u32 %s495_s26, 4  ;;  %s284_s27 = int_to_ptr.vmem [resolvable:$true] %s283_s27 }
  0x39   :  { %329 = vmatpush3.bf16.msra.mxu0 %v376_v1  ;;  %349 = vmatpush3.bf16.msra.mxu1 %v384_v4  ;;  %v381_v9 = vld [vmem:[#allocation5 + $0x28] sm:$0xff]   ;;  %v387_v10 = vld [vmem:[#allocation7 + $0x18] sm:$0xff]   ;;  %v382_v11 = vld [vmem:[#allocation5 + $0x30] sm:$0xff]   ;;  %s460_s28 = scalar_lea.vmem %s284_s27, 128  ;;  %p465_p11 = scmp.lt.s32.totalorder %s284_s27, %s284_s27 }
  0x3a   :  { %330 = vmatprep.subr.bf16.mxu0 %v493_v0  ;;  %350 = vmatprep.subr.bf16.mxu1 %v493_v0  ;;  %v383_v12 = vld [vmem:[#allocation5 + $0x38] sm:$0xff]   ;;  %v388_v14 = vld [vmem:[#allocation7 + $0x20] sm:$0xff]   ;;  %v389_v15 = vld [vmem:[#allocation7 + $0x28] sm:$0xff]   ;;  %p461_p10 = scmp.ne.s32.totalorder %s284_s27, %s460_s28  ;;  %p466_p12 = scmp.lt.s32.totalorder %s460_s28, %s460_s28 }
  0x3b   :  { %v58_v13 = vld [vmem:[#allocation2] sm:$0xf]  ;;  %v390_v16 = vld [vmem:[#allocation7 + $0x30] sm:$0xff]  }
  0x3c   :  { %v391_v17 = vld [vmem:[#allocation7 + $0x38] sm:$0xff]   ;;  %p467_p13 = por %p466_p12, %p465_p11 }
  0x3d   :  { %331 = vmatpush3.bf16.msra.mxu0 %v377_v2  ;;  %351 = vmatpush3.bf16.msra.mxu1 %v385_v6  ;;  %v293_v18 = vld [vmem:[%s580_s2] ss:$0 sm:$0xff] }
  0x3e   :  { %332 = vmatprep.subr.bf16.mxu0 %v493_v0  ;;  %352 = vmatprep.subr.bf16.mxu1 %v493_v0  ;;  %p468_p0 = pnand %p467_p13, %p461_p10 }
  0x41   :  { %333 = vmatpush3.bf16.msra.mxu0 %v378_v3  ;;  %353 = vmatpush3.bf16.msra.mxu1 %v386_v8 }
  0x42   :  { %334 = vmatprep.subr.bf16.mxu0 %v493_v0  ;;  %354 = vmatprep.subr.bf16.mxu1 %v493_v0 }
  0x45   :  { %335 = vmatpush3.bf16.msra.mxu0 %v379_v5  ;;  %355 = vmatpush3.bf16.msra.mxu1 %v387_v10 }
  0x46   :  { %336 = vmatprep.subr.bf16.mxu0 %v493_v0  ;;  %356 = vmatprep.subr.bf16.mxu1 %v493_v0 }
  0x49   :  { %337 = vmatpush3.bf16.msra.mxu0 %v380_v7  ;;  %357 = vmatpush3.bf16.msra.mxu1 %v388_v14 }
  0x4a   :  { %338 = vmatprep.subr.bf16.mxu0 %v493_v0  ;;  %358 = vmatprep.subr.bf16.mxu1 %v493_v0 }
  0x4d   :  { %339 = vmatpush3.bf16.msra.mxu0 %v381_v9  ;;  %359 = vmatpush3.bf16.msra.mxu1 %v389_v15 }
  0x4e   :  { %340 = vmatprep.subr.bf16.mxu0 %v493_v0  ;;  %360 = vmatprep.subr.bf16.mxu1 %v493_v0 }
  0x51   :  { %341 = vmatpush3.bf16.msra.mxu0 %v382_v11  ;;  %361 = vmatpush3.bf16.msra.mxu1 %v390_v16 }
  0x52   :  { %342 = vmatprep.subr.bf16.mxu0 %v493_v0  ;;  %362 = vmatprep.subr.bf16.mxu1 %v493_v0 }
  0x55   :  { %343 = vmatpush3.bf16.msra.mxu0 %v383_v12  ;;  %363 = vmatpush3.bf16.msra.mxu1 %v391_v17 }
  0x58   :  { %345 = vmatmul.mubr.bf16.vlgmr.msra.gmra.mrb[0].mxu0 %v58_v13 }
 0x12b   :  { %v164_v19 = vpop.f32.mrb[0].mxu0 }
 0x12c   :  { %v165_v20 = vadd.f32 %v293_v18, %v164_v19  ;;  %v346_v21 = vpop.f32.mrb[1].mxu0 }
 0x12d   :  { %v167_v22 = vpop.f32.mrb[2].mxu0 }
 0x12e   :  { %392 = vtanh.f32 %v165_v20  ;;  %v347_v23 = vpop.f32.mrb[3].mxu0 }
 0x138   :  { %v393_v24 = vpop.eup %392 }
 0x139   :  { %v171_v25 = vpack.c.bf16 %v393_v24, %v393_v24 }
 0x13b   :  { %365 = vmatmul.mubr.bf16.vlgmr.msra.gmra.mrb[0].mxu1 %v171_v25 }
 0x20e   :  { %v270_v26 = vpop.f32.mrb[0].mxu1 }
 0x20f   :  { %276 = vst [vmem:[#allocation8] sm:$0xff] %v270_v26  ;;  %v366_v27 = vpop.f32.mrb[1].mxu1 }
 0x210   :  { %v273_v28 = vpop.f32.mrb[2].mxu1 }
 0x211   :  { %471 = shalt.err (!%p468_p0)
}
 0x212   :  { %s472_s30 = scalar_lea.hbm %s582_s4, 128 }
 0x213   :  { %p473_p1 = scmp.ne.s32.totalorder %s582_s4, %s472_s30  ;;  %p476_p2 = scmp.lt.u32.totalorder %s472_s30, %s582_s4 }
 0x215   :  { %p478_p3 = pnand %p476_p2, %p473_p1 }
 0x217   :  { %481 = shalt.err (!%p478_p3)
}
 0x218   :  { %286 = dma.vmem_to_hbm [thread:$0]  %s284_s27, 128, %s582_s4, [#allocation4]   ;;  %v367_v29 = vpop.f32.mrb[3].mxu1 }
 0x219   :  { %486 = dma.done.wait [#allocation4], 128  }
 0x21a   :  { %487 = vsyncadd [#allocation4], 4294967168 }
 0x21b   :  { %290 = vsyncpa [#allocation3], 1 }
 0x21c   :  { %291 = vsyncpa [#allocation6], 1 }
 0x21d   :  { %292 = vsyncpa [#allocation4], 1 }

</bundles_post_ra>
